<compile_context>
chip_gen: v7x
topology: tpu7x:2x2x1
jax: 0.10.0
libtpu: 0.0.40
codegen_flags: <defaults>
</compile_context>

<pallas_src>
import functools

import jax
import jax.numpy as jnp
from jax.experimental import pallas as pl
from jax.experimental.pallas import tpu as pltpu


# --------------------------- hardware-aware budgets -------------------------
def _detect_vmem_capacity() -> int:
    try:
        return int(pltpu.get_tpu_info().vmem_capacity_bytes)
    except Exception:
        return 64 * 1024 * 1024          # v7x per-TC VMEM (smallest) — safe default


_VMEM_CAP = _detect_vmem_capacity()
_VMEM_LIMIT = min(int(_VMEM_CAP * 0.70), 100 * 1024 * 1024)   # ~44 MiB v7x, ~90 MiB v5e/v6e
_PIPE_BUDGET = int(_VMEM_LIMIT * 0.55)                        # double-buffered working set cap

# Plain-XLA fallback threshold in MACs.  Kept at 0 so the Pallas kernel is
# always exercised (incl. the demo); production could set this to ~1 << 20.
_JNP_FALLBACK_MACS = 0

_TM_REF = 256   # reference batch tile used only for the batch-independent K/N plan


def _round_up(x: int, m: int) -> int:
    return (x + m - 1) // m * m


# ------------------------------- tiling plans --------------------------------
def _plan_kn(d_in: int, d_out: int, compute_dtype):
    """Batch-independent K/N tiling plan.  Must be identical in prepare & forward."""
    bc = jnp.dtype(compute_dtype).itemsize
    bo = 4                                  # conservative (f32) output bytes for the decision
    Np = _round_up(d_out, 128)              # lane-dense output columns (one-time weight pad)

    def fits(tk, tn, with_acc):
        f = 2 * _TM_REF * tk * bc           # x blocks (double-buffered)
        f += 2 * tk * tn * bc               # W^T blocks
        f += 2 * tn * 4                     # bias
        f += 2 * _TM_REF * tn * bo          # output blocks
        if with_acc:
            f += _TM_REF * tn * 4
        return f <= _PIPE_BUDGET

    # 1) Fully weight-resident: one (d_in, Np) W block, no K loop, no N loop.
    if fits(d_in, Np, False):
        return dict(Kp=d_in, Np=Np, tk=d_in, tn=Np, kgrid=False)

    # 2) Single K tile (no reduction loop / accumulator), N tiled.
    tn = min(512, Np)
    while Np % tn:
        tn -= 128
    if fits(d_in, tn, False):
        return dict(Kp=d_in, Np=Np, tk=d_in, tn=tn, kgrid=False)

    # 3) General 3-D grid with K reduction + f32 accumulator (K tiles 256-aligned).
    tk = min(1024 if bc == 2 else 512, _round_up(d_in, 256))
    Kp = _round_up(d_in, tk)
    return dict(Kp=Kp, Np=Np, tk=tk, tn=tn, kgrid=True)


def _plan_batch(batch: int, compute_dtype, cap: int = 256):
    """Return (tm, Bp).  Avoid batch padding when possible; prefer >=2 tiles."""
    sub = 16 if jnp.dtype(compute_dtype).itemsize == 2 else 8   # packed-sublane multiple
    if batch <= cap:
        if batch % (2 * sub) == 0:
            return batch // 2, batch        # 2 parallel batch tiles (v7x dual-TC)
        return batch, batch                 # full-extent block: always legal, no pad
    tm = cap
    return tm, _round_up(batch, tm)


# ------------------------------- kernel bodies -------------------------------
def _linear_act_kernel(x_ref, w_ref, b_ref, o_ref, *, activation):
    """Single-K-tile path: dot + bias + activation fused straight into o_ref."""
    y = jnp.dot(x_ref[...], w_ref[...], preferred_element_type=jnp.float32)
    y = y + b_ref[...]                       # f32 bias broadcast [1, tn]
    if activation == "relu":
        y = jnp.maximum(y, 0.0)
    o_ref[...] = y.astype(o_ref.dtype)


def _linear_act_kacc_kernel(x_ref, w_ref, b_ref, o_ref, acc_ref, *, activation):
    """General path: K-reduction with f32 VMEM accumulator, fused epilogue."""
    k = pl.program_id(2)

    @pl.when(k == 0)
    def _init():
        acc_ref[...] = jnp.zeros_like(acc_ref)

    acc_ref[...] += jnp.dot(x_ref[...], w_ref[...], preferred_element_type=jnp.float32)

    @pl.when(k == pl.num_programs(2) - 1)
    def _finalize():
        y = acc_ref[...] + b_ref[...]
        if activation == "relu":
            y = jnp.maximum(y, 0.0)
        o_ref[...] = y.astype(o_ref.dtype)


# ------------------------------ pallas_call wrap ------------------------------
def _pallas_linear_act(xp, wt_p, b_p, out_dtype, *, tm, tn, tk, kgrid, activation):
    Bp, Kp = xp.shape
    _, Np = wt_p.shape

    if not kgrid:
        grid = (Bp // tm, Np // tn)
        kern = functools.partial(_linear_act_kernel, activation=activation)
        return pl.pallas_call(
            kern,
            out_shape=jax.ShapeDtypeStruct((Bp, Np), out_dtype),
            grid_spec=pltpu.PrefetchScalarGridSpec(
                num_scalar_prefetch=0,
                grid=grid,
                in_specs=[
                    pl.BlockSpec((tm, Kp), lambda i, j: (i, 0)),   # x: reused across j
                    pl.BlockSpec((Kp, tn), lambda i, j: (0, j)),   # W^T: constant across i
                    pl.BlockSpec((1, tn), lambda i, j: (0, j)),    # bias
                ],
                out_specs=pl.BlockSpec((tm, tn), lambda i, j: (i, j)),
            ),
            compiler_params=pltpu.CompilerParams(
                dimension_semantics=("parallel", "parallel"),
                vmem_limit_bytes=_VMEM_LIMIT,
            ),
        )(xp, wt_p, b_p)

    grid = (Bp // tm, Np // tn, Kp // tk)
    kern = functools.partial(_linear_act_kacc_kernel, activation=activation)
    return pl.pallas_call(
        kern,
        out_shape=jax.ShapeDtypeStruct((Bp, Np), out_dtype),
        grid_spec=pltpu.PrefetchScalarGridSpec(
            num_scalar_prefetch=0,
            grid=grid,
            in_specs=[
                pl.BlockSpec((tm, tk), lambda i, j, k: (i, k)),
                pl.BlockSpec((tk, tn), lambda i, j, k: (k, j)),
                pl.BlockSpec((1, tn), lambda i, j, k: (0, j)),
            ],
            out_specs=pl.BlockSpec((tm, tn), lambda i, j, k: (i, j)),
            scratch_shapes=[pltpu.VMEM((tm, tn), jnp.float32)],
        ),
        compiler_params=pltpu.CompilerParams(
            dimension_semantics=("parallel", "parallel", "arbitrary"),
            vmem_limit_bytes=_VMEM_LIMIT,
        ),
    )(xp, wt_p, b_p)


# --------------------------- parameter preparation ---------------------------
def prepare_params(weights, biases, compute_dtype=jnp.bfloat16):
    """One-time prep (at parameter-init time, NOT per forward call).

    weights: [d_out, d_in] (PyTorch convention) -> padded [Kp, Np] W^T in compute_dtype
    biases:  [d_out]                            -> padded [1, Np] f32
    """
    d_out, d_in = weights.shape
    plan = _plan_kn(d_in, d_out, compute_dtype)
    Kp, Np = plan["Kp"], plan["Np"]

    if Kp == d_in and Np == d_out:
        wt = weights.T.astype(compute_dtype)
    else:
        wt = jnp.zeros((Kp, Np), dtype=compute_dtype)
        wt = wt.at[:d_in, :d_out].set(weights.T.astype(compute_dtype))

    b = jnp.zeros((1, Np), dtype=jnp.float32)
    b = b.at[0, :d_out].set(biases.astype(jnp.float32))
    return wt, b


# -------------------------------- forward pass --------------------------------
@functools.partial(jax.jit, static_argnames=("out_features", "activation"))
def simple_activation_forward(x, wt_p, b_p, out_features, activation="relu"):
    """x: [B, d_in], prepared wt_p/b_p -> [B, out_features] (dtype of x)."""
    B, d_in = x.shape
    compute_dtype = wt_p.dtype
    plan = _plan_kn(d_in, out_features, compute_dtype)
    Kp, Np, tk, tn, kgrid = plan["Kp"], plan["Np"], plan["tk"], plan["tn"], plan["kgrid"]
    assert wt_p.shape == (Kp, Np), "wt_p was prepared with a different plan"
    assert b_p.shape == (1, Np)

    if B * d_in * out_features < _JNP_FALLBACK_MACS:
        y = jnp.dot(x.astype(compute_dtype), wt_p[:d_in, :out_features],
                    preferred_element_type=jnp.float32) + b_p[0, :out_features]
        if activation == "relu":
            y = jnp.maximum(y, 0.0)
        return y.astype(x.dtype)

    tm, Bp = _plan_batch(B, compute_dtype)
    xc = x.astype(compute_dtype)
    if Bp != B or Kp != d_in:                       # pad only when the plan requires it
        xc = jnp.pad(xc, ((0, Bp - B), (0, Kp - d_in)))

    out = _pallas_linear_act(xc, wt_p, b_p, x.dtype,
                             tm=tm, tn=tn, tk=tk, kgrid=kgrid, activation=activation)
    if Bp != B or Np != out_features:
        out = out[:B, :out_features]
    return out


@functools.partial(jax.jit, static_argnames=("activation", "compute_dtype"))
def simple_activation_layer(x, weights, biases, activation="relu",
                            compute_dtype=jnp.bfloat16):
    """One-shot API matching SimpleActivationLayer.forward (ReLU default).

    Prefer prepare_params + simple_activation_forward to hoist the one-time
    transpose/padding out of the per-call path.
    """
    d_out = weights.shape[0]
    wt_p, b_p = prepare_params(weights, biases, compute_dtype)
    return simple_activation_forward(x, wt_p, b_p, out_features=d_out,
                                     activation=activation)


# TODO(synk): the PyTorch module accepts arbitrary `activation` callables; the
# kernel epilogue only supports "relu" and None (identity).

if __name__ == "__main__":
    key = jax.random.PRNGKey(0)
    kx, kw, kb = jax.random.split(key, 3)

    batch, input_size, output_size = 8, 32, 64
    x = jax.random.normal(kx, (batch, input_size), dtype=jnp.float32)
    weights = jax.random.normal(kw, (output_size, input_size), dtype=jnp.float32)
    biases = jax.random.normal(kb, (output_size,), dtype=jnp.float32)

    ref = jnp.maximum(x @ weights.T + biases, 0.0)

    # f32 compute path (tight tolerance vs. reference).
    wt32, b32 = prepare_params(weights, biases, compute_dtype=jnp.float32)
    out32 = jax.block_until_ready(
        simple_activation_forward(x, wt32, b32, out_features=output_size))
    assert out32.shape == (batch, output_size)
    assert jnp.allclose(out32, ref, atol=1e-5, rtol=1e-5), "f32 path mismatch"

    # Default bf16-operand path (MXU-native); expected bf16-level precision.
    out_bf = jax.block_until_ready(simple_activation_layer(x, weights, biases))
    assert out_bf.shape == (batch, output_size)
    assert jnp.allclose(out_bf, ref, atol=0.1, rtol=0.05), "bf16 path mismatch"

    print("KERNEL_OK")
</pallas_src>

<mosaic_0001>
module attributes {stable_mosaic.version = 11 : i64} {
  func.func @_linear_act_kernel(%arg0: i32, %arg1: i32, %arg2: memref<8x32xf32, #tpu.memory_space<vmem>>, %arg3: memref<32x128xf32, #tpu.memory_space<vmem>>, %arg4: memref<1x128xf32, #tpu.memory_space<vmem>>, %arg5: memref<8x128xf32, #tpu.memory_space<vmem>>) attributes {dimension_semantics = [#tpu.dimension_semantics<parallel>, #tpu.dimension_semantics<parallel>], iteration_bounds = array<i64: 1, 1>, scalar_prefetch = 0 : i64, scratch_operands = 0 : i64, tpu.core_type = #tpu.core_type<tc>, window_params = [{transform_indices = @transform_0, window_bounds = array<i64: 8, 32>}, {transform_indices = @transform_1, window_bounds = array<i64: 32, 128>}, {transform_indices = @transform_2, window_bounds = array<i64: 1, 128>}, {transform_indices = @transform_3, window_bounds = array<i64: 8, 128>}]} {
    %c0 = arith.constant 0 : index
    %c0_0 = arith.constant 0 : index
    %0 = vector.load %arg2[%c0, %c0_0] : memref<8x32xf32, #tpu.memory_space<vmem>>, vector<8x32xf32>
    %c0_1 = arith.constant 0 : index
    %c0_2 = arith.constant 0 : index
    %1 = vector.load %arg3[%c0_1, %c0_2] : memref<32x128xf32, #tpu.memory_space<vmem>>, vector<32x128xf32>
    %cst = arith.constant dense<0.000000e+00> : vector<8x128xf32>
    %2 = tpu.matmul %0, %1, %cst {dimension_numbers = #tpu.dot_dimension_numbers<[1], [0], [0], [1], [0, 0, 1, 1], [], []>} : vector<8x32xf32>, vector<32x128xf32>, vector<8x128xf32> -> vector<8x128xf32>
    %c0_3 = arith.constant 0 : index
    %c0_4 = arith.constant 0 : index
    %3 = vector.load %arg4[%c0_3, %c0_4] : memref<1x128xf32, #tpu.memory_space<vmem>>, vector<1x128xf32>
    %4 = vector.broadcast %3 : vector<1x128xf32> to vector<8x128xf32>
    %5 = arith.addf %2, %4 : vector<8x128xf32>
    %cst_5 = arith.constant 0.000000e+00 : f32
    %6 = vector.broadcast %cst_5 : f32 to vector<8x128xf32>
    %7 = arith.maximumf %5, %6 : vector<8x128xf32>
    %c0_6 = arith.constant 0 : index
    %c0_7 = arith.constant 0 : index
    %8 = vector.load %arg5[%c0_6, %c0_7] : memref<8x128xf32, #tpu.memory_space<vmem>>, vector<8x128xf32>
    tpu.vector_store %arg5[%c0_6, %c0_7], %7 {strides = array<i32>} : memref<8x128xf32, #tpu.memory_space<vmem>>, vector<8x128xf32>,
    return
  }
  func.func @transform_0(%arg0: i32, %arg1: i32) -> (i32, i32) {
    %c0_i32 = arith.constant 0 : i32
    %c0_i32_0 = arith.constant 0 : i32
    return %arg0, %c0_i32 : i32, i32
  }
  func.func @transform_1(%arg0: i32, %arg1: i32) -> (i32, i32) {
    %c0_i32 = arith.constant 0 : i32
    %c0_i32_0 = arith.constant 0 : i32
    return %c0_i32, %arg1 : i32, i32
  }
  func.func @transform_2(%arg0: i32, %arg1: i32) -> (i32, i32) {
    %c0_i32 = arith.constant 0 : i32
    %c0_i32_0 = arith.constant 0 : i32
    return %c0_i32, %arg1 : i32, i32
  }
  func.func @transform_3(%arg0: i32, %arg1: i32) -> (i32, i32) {
    %c0_i32 = arith.constant 0 : i32
    return %arg0, %arg1 : i32, i32
  }
}

</mosaic_0001>

<bundles_post_ra>
// kernel: simple_activation_forward.1
= control target key start
LH: loop header
LB: loop body
LE: loop exit
PB: predicated region body
PF: predicated region fallthrough
CT: control target
= control target key end

     0   :  { %8 = vsyncpa [#allocation3], 0  ;;  %s323_s0 = inlined_call_operand.hbm [shape: f32[8,32], index: 0, kind: input, shape index: {}]   ;;  %s324_s1 = inlined_call_operand.hbm [shape: f32[32,128], index: 1, kind: input, shape index: {}]   ;;  %s325_s2 = inlined_call_operand.vmem [shape: f32[1,128], index: 2, kind: input, shape index: {}]   ;;  %s326_s3 = inlined_call_operand.hbm [shape: f32[8,128], index: 3, kind: output, shape index: {}]  }
   0x1   :  { %9 = vsyncpa [#allocation6], 0 }
   0x2   :  { %10 = vsyncpa [#allocation4], 0  ;;  %s249_s12 = smov [#allocation2]   ;;  %s250_s14 = smov [#allocation5]  }
   0x3   :  { %s17_s13 = sshll.u32 %s249_s12, 4  ;;  %s26_s15 = sshll.u32 %s250_s14, 4  ;;  %s18_s13 = int_to_ptr.vmem [resolvable:$true] %s17_s13  ;;  %s277_s15 = int_to_ptr.vmem [resolvable:$true] %s26_s15 }
   0x4   :  { %s177_s18 = scalar_lea.hbm %s323_s0, 128 }
   0x5   :  { %p178_p0 = scmp.ne.s32.totalorder %s323_s0, %s177_s18  ;;  %p181_p1 = scmp.lt.u32.totalorder %s177_s18, %s323_s0 }
   0x7   :  { %p183_p2 = pnand %p181_p1, %p178_p0 }
   0x9   :  { %186 = shalt.err (!%p183_p2)
}
   0xa   :  { %s187_s23 = scalar_lea.vmem %s18_s13, 128  ;;  %p192_p4 = scmp.lt.s32.totalorder %s18_s13, %s18_s13 }
   0xb   :  { %p188_p3 = scmp.ne.s32.totalorder %s18_s13, %s187_s23  ;;  %p193_p5 = scmp.lt.s32.totalorder %s187_s23, %s187_s23 }
   0xd   :  { %p194_p6 = por %p193_p5, %p192_p4 }
   0xf   :  { %p195_p7 = pnand %p194_p6, %p188_p3 }
  0x11   :  { %198 = shalt.err (!%p195_p7)
}
  0x12   :  { %20 = dma.hbm_to_vmem [thread:$0]  %s323_s0, 128, %s18_s13, [#allocation3]  }
  0x13   :  { %s199_s28 = scalar_lea.hbm %s324_s1, 512 }
  0x14   :  { %p200_p8 = scmp.ne.s32.totalorder %s324_s1, %s199_s28  ;;  %p203_p9 = scmp.lt.u32.totalorder %s199_s28, %s324_s1 }
  0x16   :  { %p205_p10 = pnand %p203_p9, %p200_p8 }
  0x18   :  { %208 = shalt.err (!%p205_p10)
}
  0x19   :  { %s209_s6 = scalar_lea.vmem %s277_s15, 512  ;;  %p214_p12 = scmp.lt.s32.totalorder %s277_s15, %s277_s15 }
  0x1a   :  { %p210_p11 = scmp.ne.s32.totalorder %s277_s15, %s209_s6  ;;  %p215_p13 = scmp.lt.s32.totalorder %s209_s6, %s209_s6 }
  0x1c   :  { %p216_p0 = por %p215_p13, %p214_p12 }
  0x1e   :  { %p217_p1 = pnand %p216_p0, %p210_p11 }
  0x20   :  { %220 = shalt.err (!%p217_p1)
}
  0x21   :  { %s251_s0 = smov 128   ;;  %s252_s7 = smov 8  }
  0x22   :  { %32 = dma.hbm_to_vmem [thread:$0]  %s324_s1, 512, %s277_s15, [#allocation6], %s251_s0, %s251_s0, %s252_s7  }
  0x23   :  { %243 = dma.done.wait [#allocation3], 128  }
  0x24   :  { %244 = vsyncadd [#allocation3], 4294967168 }
  0x25   :  { %245 = dma.done.wait [#allocation6], 512  }
  0x26   :  { %246 = vsyncadd [#allocation6], 4294966784  ;;  %v253_v0 = vmov 0.0|0.0   ;;  %vm254_vm0 = vmmov 0   ;;  %v255_v1 = vmov 0.0   ;;  %v42_v2 = vld [vmem:[#allocation5] sm:$0xff] }
  0x27   :  { %163 = vmatprep.subr.bf16.mxu0 %v253_v0  ;;  %160 = vmatprep.mubr.msk.f32.mxu0 %vm254_vm0, %v255_v1  ;;  %v43_v3 = vld [vmem:[#allocation5 + $0x8] sm:$0xff]  ;;  %v44_v4 = vld [vmem:[#allocation5 + $0x10] sm:$0xff]  ;;  %v45_v6 = vld [vmem:[#allocation5 + $0x18] sm:$0xff]  ;;  %vm53_vm1 = vcmask 261120   ;;  %s256_s11 = smov [#allocation7]  }
  0x28   :  { %v164_v5 = vpack.c.bf16 %v43_v3, %v42_v2  ;;  %v167_v7 = vpack.c.bf16 %v45_v6, %v44_v4  ;;  %v41_v8 = vld [vmem:[#allocation2] sm:$0xff]  ;;  %s135_s12 = sshll.u32 %s256_s11, 4  ;;  %s136_s12 = int_to_ptr.vmem [resolvable:$true] %s135_s12 }
  0x29   :  { %v145_v9 = vld [vmem:[%s325_s2] ss:$0 sm:$0xff]  ;;  %s221_s13 = scalar_lea.vmem %s136_s12, 128  ;;  %p226_p3 = scmp.lt.s32.totalorder %s136_s12, %s136_s12 }
  0x2a   :  { %165 = vmatpush3.bf16.msra.mxu0 %v164_v5  ;;  %p222_p2 = scmp.ne.s32.totalorder %s136_s12, %s221_s13  ;;  %p227_p4 = scmp.lt.s32.totalorder %s221_s13, %s221_s13 }
  0x2b   :  { %166 = vmatprep.subr.bf16.mxu0 %v253_v0 }
  0x2c   :  { %p228_p5 = por %p227_p4, %p226_p3 }
  0x2e   :  { %168 = vmatpush3.bf16.msra.mxu0 %v167_v7  ;;  %p229_p6 = pnand %p228_p5, %p222_p2 }
  0x31   :  { %161 = vmatmul.mubr.msk.f32.vlgmr.msra.gmra.mrb[0].mxu0 %vm53_vm1, %v41_v8 }
 0x104   :  { %v123_v10 = vpop.f32.mrb[0].mxu0 }
 0x105   :  { %v124_v11 = vadd.f32 %v145_v9, %v123_v10  ;;  %v162_v12 = vpop.f32.mrb[1].mxu0 }
 0x107   :  { %v127_v13 = vmax.f32 %v124_v11, 0.0 }
 0x109   :  { %128 = vst [vmem:[#allocation7] sm:$0xff] %v127_v13 }
 0x10a   :  { %232 = shalt.err (!%p229_p6)
}
 0x10b   :  { %s233_s16 = scalar_lea.hbm %s326_s3, 128 }
 0x10c   :  { %p234_p7 = scmp.ne.s32.totalorder %s326_s3, %s233_s16  ;;  %p237_p8 = scmp.lt.u32.totalorder %s233_s16, %s326_s3 }
 0x10e   :  { %p239_p9 = pnand %p237_p8, %p234_p7 }
 0x110   :  { %242 = shalt.err (!%p239_p9)
}
 0x111   :  { %138 = dma.vmem_to_hbm [thread:$0]  %s136_s12, 128, %s326_s3, [#allocation4]  }
 0x112   :  { %247 = dma.done.wait [#allocation4], 128  }
 0x113   :  { %248 = vsyncadd [#allocation4], 4294967168 }
 0x114   :  { %142 = vsyncpa [#allocation3], 1 }
 0x115   :  { %143 = vsyncpa [#allocation6], 1 }
 0x116   :  { %144 = vsyncpa [#allocation4], 1 }

</bundles_post_ra>
